<compile_context>
chip_gen: v5e
topology: v5e:2x2
jax: 0.10.0
libtpu: 0.0.40
codegen_flags: <defaults>
</compile_context>

<pallas_src>
import functools

import numpy as np
import jax
import jax.numpy as jnp
from jax.experimental import pallas as pl
from jax.experimental.pallas import tpu as pltpu


# Below this many frames the VPU mul + sublane-reduce pooling is cheaper (and
# trivially lowers); at/above it the contraction over frames is emitted as a
# batched MXU einsum (review: at N>=64 the XLU reduce becomes the critical
# path while the MXU idles).  Static shapes -> this is a trace-time switch.
_MXU_POOL_MIN_FRAMES = 64


# ----------------------------- packing helpers ----------------------------- #
def _r8(n):
    return -(-n // 8) * 8


def _h_offsets(dt, ds, length):
    off_wt = 0
    off_ws = off_wt + _r8(dt)
    off_tab = off_ws + _r8(ds)
    off_misc = off_tab + _r8(length)
    rows = off_misc + 8
    return off_wt, off_ws, off_tab, off_misc, rows


def _a_offsets(hidden):
    off_wat = 0
    off_was = _r8(hidden)
    off_ba = 2 * _r8(hidden)
    rows = off_ba + 8
    return off_wat, off_was, off_ba, rows


def pack_params(p):
    """Pack the 10 small parameter tensors into 2 arrays (done once, host-side).

    Kept in f32 (bias / elementwise math stays f32 for v5e); the matmul weight
    slices are cast to bf16 inside the kernel right before feeding the MXU.
    """
    dt, hidden = p["w_t"].shape
    ds = p["w_s"].shape[0]
    length = p["time_table"].shape[0]
    act = p["w_at"].shape[1]

    off_wt, off_ws, off_tab, off_misc, rows_h = _h_offsets(dt, ds, length)
    wh = np.zeros((rows_h, hidden), np.float32)
    wh[off_wt:off_wt + dt] = np.asarray(p["w_t"])
    wh[off_ws:off_ws + ds] = np.asarray(p["w_s"])
    wh[off_tab:off_tab + length] = np.asarray(p["time_table"])
    wh[off_misc + 0] = np.asarray(p["b_t"])[0]
    wh[off_misc + 1] = np.asarray(p["b_s"])[0]
    wh[off_misc + 2] = np.asarray(p["b_r"])[0]
    wh[off_misc + 3] = np.asarray(p["w_r"])[0]

    off_wat, off_was, off_ba, rows_a = _a_offsets(hidden)
    wa = np.zeros((rows_a, act), np.float32)
    wa[off_wat:off_wat + hidden] = np.asarray(p["w_at"])
    wa[off_was:off_was + hidden] = np.asarray(p["w_as"])
    wa[off_ba] = np.asarray(p["b_a"])[0]

    return jnp.asarray(wh), jnp.asarray(wa)


# ----------------------------- Pallas kernel ------------------------------- #
def _policy_kernel(
    tf_ref,      # (Bb, NT, DT)  teacher frames, f32
    sf_ref,      # (Bb, NS, DS)  student frames, f32
    tmask_ref,   # (Bb, NT)      teacher attention mask, f32 (0/1)
    smask_ref,   # (Bb, NS)      student attention mask, f32 (0/1)
    tts_ref,     # (Bb, NT)      teacher timesteps, int32
    sts_ref,     # (Bb, NS)      student timesteps, int32
    rtg_ref,     # (Bb, NS, 1)   returns-to-go, f32
    wh_ref,      # (RH, H)       packed H-wide params, f32
    wa_ref,      # (RA, A)       packed A-wide params, f32
    out_ref,     # (Bb, A)
    *, L, off_wt, off_ws, off_tab, off_misc, off_wat, off_was, off_ba,
):
    f32 = jnp.float32
    bf16 = jnp.bfloat16
    Bb, NT, DT = tf_ref.shape
    _, NS, DS = sf_ref.shape
    H = wh_ref.shape[1]

    # ---- unpack parameters (static slices of the packed arrays) ----------- #
    wh = wh_ref[...]
    w_t = wh[off_wt:off_wt + DT].astype(bf16)       # (DT, H)  MXU operand
    w_s = wh[off_ws:off_ws + DS].astype(bf16)       # (DS, H)
    table = wh[off_tab:off_tab + L].astype(bf16)    # (L, H)
    b_t = wh[off_misc + 0:off_misc + 1]             # (1, H)  f32
    b_s = wh[off_misc + 1:off_misc + 2]
    b_r = wh[off_misc + 2:off_misc + 3]
    w_r = wh[off_misc + 3:off_misc + 4]

    wa = wa_ref[...]
    w_at = wa[off_wat:off_wat + H].astype(bf16)     # (H, A)
    w_as = wa[off_was:off_was + H].astype(bf16)
    b_a = wa[off_ba:off_ba + 1]                     # (1, A)  f32

    # ---- per-frame side inputs -------------------------------------------- #
    t_mask = tmask_ref[...]                         # (Bb, NT) f32
    s_mask = smask_ref[...]
    t_ts = tts_ref[...]                             # int32 (no f32 round-trip)
    s_ts = sts_ref[...]
    rtg = rtg_ref[...]                              # (Bb, NS, 1) f32

    # ---- masked pooling of the raw inputs (pool-before-linear) ------------ #
    # NOTE: out-of-range timesteps give an all-zero one-hot row (zero time
    #       embedding) rather than erroring like nn.Embedding would.
    def masked_sum(mask_bn, x_bnd, n):
        if n >= _MXU_POOL_MIN_FRAMES:
            # Contraction over frames on the MXU (batched einsum, bf16 in /
            # f32 accumulate); mask multiply is fused into the matmul.
            return jnp.einsum(
                "bqn,bnd->bqd",
                mask_bn[:, None, :].astype(bf16), x_bnd.astype(bf16),
                preferred_element_type=f32)[:, 0, :]
        # Tiny-N path: VPU multiply + sublane reduce, f32 (v5e-friendly).
        return jnp.sum(x_bnd.astype(f32) * mask_bn[:, :, None], axis=1)

    def hist(mask_bn, ts_bn, n):
        # mask-weighted timestep histogram -> (Bb, L)
        # TODO(synk): if max_length grows past ~128, restructure (per-frame
        #             (B*N, L) one-hot straight into the MXU or a fori_loop
        #             gather) instead of a (Bb, N, L) resident one-hot.
        iota = jax.lax.broadcasted_iota(jnp.int32, (Bb, n, L), 2)
        eq = ts_bn[:, :, None] == iota
        if n >= _MXU_POOL_MIN_FRAMES:
            return jnp.einsum(
                "bqn,bnl->bql",
                mask_bn[:, None, :].astype(bf16), eq.astype(bf16),
                preferred_element_type=f32)[:, 0, :]
        # Mask folded into the compare: single select, no extra multiply.
        valid = eq & (mask_bn[:, :, None] > 0.5)
        return jnp.sum(valid.astype(f32), axis=1)

    t_cnt = jnp.sum(t_mask, axis=1, keepdims=True)          # (Bb, 1)
    s_cnt = jnp.sum(s_mask, axis=1, keepdims=True)
    # approx reciprocal -> EUP slot (free next to the VPU work).
    t_inv = pl.reciprocal(jnp.maximum(t_cnt, 1.0), approx=True)
    s_inv = pl.reciprocal(jnp.maximum(s_cnt, 1.0), approx=True)
    t_any = t_cnt * t_inv   # ~1.0 if any valid frame else 0.0 (bias scaling)
    s_any = s_cnt * s_inv

    t_mean = masked_sum(t_mask, tf_ref[...], NT) * t_inv     # (Bb, DT)
    s_mean = masked_sum(s_mask, sf_ref[...], NS) * s_inv     # (Bb, DS)
    rtg_mean = jnp.sum(rtg * s_mask[:, :, None], axis=1) * s_inv   # (Bb, 1)

    # ---- single merged time-embedding matmul for both branches ------------ #
    hists = jnp.concatenate(
        [hist(t_mask, t_ts, NT) * t_inv, hist(s_mask, s_ts, NS) * s_inv], axis=0
    )                                                        # (2*Bb, L) f32
    time_emb = jnp.dot(hists.astype(bf16), table,
                       preferred_element_type=f32)           # (2*Bb, H)
    t_time = time_emb[:Bb]
    s_time = time_emb[Bb:]

    # ---- branch embeddings on B rows (not B*N), bf16 MXU operands --------- #
    t_pool = (jnp.dot(t_mean.astype(bf16), w_t, preferred_element_type=f32)
              + t_any * b_t + t_time)
    s_pool = (jnp.dot(s_mean.astype(bf16), w_s, preferred_element_type=f32)
              + s_any * (b_s + b_r)
              + rtg_mean * w_r          # VPU broadcast instead of K=1 matmul
              + s_time)

    # ---- action head (split weights avoid a lane concat) ------------------ #
    act = jnp.tanh(
        jnp.dot(t_pool.astype(bf16), w_at, preferred_element_type=f32)
        + jnp.dot(s_pool.astype(bf16), w_as, preferred_element_type=f32)
        + b_a
    )
    # NOTE: A=4 < 128 lanes -> masked partial store; negligible at this size.
    out_ref[...] = act.astype(out_ref.dtype)


# ------------------------------ JAX wrapper --------------------------------- #
@functools.partial(jax.jit, static_argnames=("max_length",))
def translation_policy_forward(
    teacher_frames, student_frames,
    teacher_attn_mask, student_attn_mask,
    teacher_time_steps, student_time_steps,
    returns_to_go, wh, wa, *, max_length,
):
    """Expected dtypes: frames/masks/rtg f32, timesteps int32, params f32.
    No wrapper-side casts/packs -> no extra XLA ops or HBM passes."""
    B, NT, DT = teacher_frames.shape
    _, NS, DS = student_frames.shape
    RH, H = wh.shape
    RA, A = wa.shape
    L = max_length

    off_wt, off_ws, off_tab, off_misc, _ = _h_offsets(DT, DS, L)
    off_wat, off_was, off_ba, _ = _a_offsets(H)

    kernel = functools.partial(
        _policy_kernel, L=L,
        off_wt=off_wt, off_ws=off_ws, off_tab=off_tab, off_misc=off_misc,
        off_wat=off_wat, off_was=off_was, off_ba=off_ba,
    )

    # Batch is a parallel grid axis (length 1 at this toy B).  For production:
    #   - v7x: pick bb as a multiple of 8 with bb <= B/2 so >=2 grid steps can
    #     shard across the two TensorCores, and size 2 pipeline buffers of
    #     (bb*NT*DT + bb*NS*DS) f32 against the 64 MiB VMEM / vmem_limit_bytes.
    #   - v5e/v6e (single TC, serial grid): the largest bb that fits VMEM.
    bb = B
    grid = (pl.cdiv(B, bb),)

    return pl.pallas_call(
        kernel,
        out_shape=jax.ShapeDtypeStruct((B, A), jnp.float32),
        grid=grid,
        in_specs=[
            pl.BlockSpec((bb, NT, DT), lambda i: (i, 0, 0)),
            pl.BlockSpec((bb, NS, DS), lambda i: (i, 0, 0)),
            pl.BlockSpec((bb, NT), lambda i: (i, 0)),
            pl.BlockSpec((bb, NS), lambda i: (i, 0)),
            pl.BlockSpec((bb, NT), lambda i: (i, 0)),
            pl.BlockSpec((bb, NS), lambda i: (i, 0)),
            pl.BlockSpec((bb, NS, 1), lambda i: (i, 0, 0)),
            pl.BlockSpec((RH, H), lambda i: (0, 0)),
            pl.BlockSpec((RA, A), lambda i: (0, 0)),
        ],
        out_specs=pl.BlockSpec((bb, A), lambda i: (i, 0)),
        compiler_params=pltpu.CompilerParams(
            dimension_semantics=("parallel",),
            vmem_limit_bytes=32 * 1024 * 1024,   # explicit; safe on v7x 64 MiB
        ),
    )(teacher_frames, student_frames,
      teacher_attn_mask, student_attn_mask,
      teacher_time_steps, student_time_steps,
      returns_to_go, wh, wa)


# ----------------------------- parameter init ------------------------------- #
def init_params(key, state_dims, act_dims, teacher_dims, hidden, max_length):
    ks = jax.random.split(key, 8)
    s = lambda k, shape, scale: (scale * jax.random.normal(k, shape)).astype(jnp.float32)
    return {
        "w_t": s(ks[0], (teacher_dims, hidden), 0.05),
        "b_t": jnp.zeros((1, hidden), jnp.float32),
        "w_s": s(ks[1], (state_dims, hidden), 0.05),
        "b_s": jnp.zeros((1, hidden), jnp.float32),
        "w_r": s(ks[2], (1, hidden), 0.05),
        "b_r": jnp.zeros((1, hidden), jnp.float32),
        "time_table": s(ks[3], (max_length, hidden), 0.02),
        "w_at": s(ks[4], (hidden, act_dims), 0.05),
        "w_as": s(ks[5], (hidden, act_dims), 0.05),
        "b_a": jnp.zeros((1, act_dims), jnp.float32),
    }


# ---------------------------- pure-JAX reference ----------------------------- #
def reference_forward(teacher_frames, student_frames, teacher_attn_mask,
                      student_attn_mask, teacher_time_steps, student_time_steps,
                      returns_to_go, p):
    """True f32 math (PyTorch-equivalent); the kernel uses bf16 MXU operands,
    so comparison tolerance is set for bf16 (~0.4% relative) rounding."""
    f32 = jnp.float32
    t_emb = (teacher_frames @ p["w_t"] + p["b_t"]
             + p["time_table"][teacher_time_steps])
    s_emb = (student_frames @ p["w_s"] + p["b_s"]
             + returns_to_go * p["w_r"] + p["b_r"]
             + p["time_table"][student_time_steps])

    def mmean(e, m):
        m = m[..., None].astype(f32)
        return (e * m).sum(1) / jnp.maximum(m.sum(1), 1.0)

    t_pool = mmean(t_emb, teacher_attn_mask)
    s_pool = mmean(s_emb, student_attn_mask)
    return jnp.tanh(t_pool @ p["w_at"] + s_pool @ p["w_as"] + p["b_a"])


# --------------------------------- main -------------------------------------- #
if __name__ == "__main__":
    B, N_T, N_S = 2, 8, 8
    state_dims, act_dims, teacher_dims = 32, 4, 24
    hidden, max_length = 32, 16

    key = jax.random.PRNGKey(0)
    k_p, k_tf, k_sf, k_rtg, k_tts, k_sts = jax.random.split(key, 6)

    params = init_params(k_p, state_dims, act_dims, teacher_dims, hidden, max_length)
    wh, wa = pack_params(params)

    teacher_frames = jax.random.normal(k_tf, (B, N_T, teacher_dims), jnp.float32)
    student_frames = jax.random.normal(k_sf, (B, N_S, state_dims), jnp.float32)
    returns_to_go = jax.random.normal(k_rtg, (B, N_S, 1), jnp.float32)

    teacher_time_steps = jax.random.randint(k_tts, (B, N_T), 0, max_length, jnp.int32)
    student_time_steps = jax.random.randint(k_sts, (B, N_S), 0, max_length, jnp.int32)

    teacher_attn_mask = (jnp.arange(N_T)[None, :] <
                         jnp.array([[N_T], [N_T - 3]])).astype(jnp.float32)
    student_attn_mask = (jnp.arange(N_S)[None, :] <
                         jnp.array([[N_S - 2], [N_S]])).astype(jnp.float32)

    actions = translation_policy_forward(
        teacher_frames, student_frames,
        teacher_attn_mask, student_attn_mask,
        teacher_time_steps, student_time_steps,
        returns_to_go, wh, wa, max_length=max_length,
    )
    jax.block_until_ready(actions)

    ref = reference_forward(
        teacher_frames, student_frames, teacher_attn_mask, student_attn_mask,
        teacher_time_steps, student_time_steps, returns_to_go, params,
    )

    assert actions.shape == (B, act_dims)
    assert bool(jnp.all(jnp.isfinite(actions)))
    # bf16 MXU operands + approx reciprocal vs true-f32 reference.
    assert bool(jnp.allclose(actions, ref, atol=2e-2, rtol=2e-2)), (
        "mismatch vs reference"
    )
    print("KERNEL_OK")
</pallas_src>

<mosaic_0001>
module attributes {stable_mosaic.version = 11 : i64} {
  func.func @_policy_kernel(%arg0: i32, %arg1: memref<2x8x24xf32, #tpu.memory_space<vmem>>, %arg2: memref<2x8x32xf32, #tpu.memory_space<vmem>>, %arg3: memref<2x8xf32, #tpu.memory_space<vmem>>, %arg4: memref<2x8xf32, #tpu.memory_space<vmem>>, %arg5: memref<2x8xi32, #tpu.memory_space<vmem>>, %arg6: memref<2x8xi32, #tpu.memory_space<vmem>>, %arg7: memref<2x8x1xf32, #tpu.memory_space<vmem>>, %arg8: memref<80x32xf32, #tpu.memory_space<vmem>>, %arg9: memref<72x4xf32, #tpu.memory_space<vmem>>, %arg10: memref<2x4xf32, #tpu.memory_space<vmem>>) attributes {dimension_semantics = [#tpu.dimension_semantics<parallel>], iteration_bounds = array<i64: 1>, scalar_prefetch = 0 : i64, scratch_operands = 0 : i64, tpu.core_type = #tpu.core_type<tc>, window_params = [{transform_indices = @transform_0, window_bounds = array<i64: 2, 8, 24>}, {transform_indices = @transform_1, window_bounds = array<i64: 2, 8, 32>}, {transform_indices = @transform_2, window_bounds = array<i64: 2, 8>}, {transform_indices = @transform_3, window_bounds = array<i64: 2, 8>}, {transform_indices = @transform_4, window_bounds = array<i64: 2, 8>}, {transform_indices = @transform_5, window_bounds = array<i64: 2, 8>}, {transform_indices = @transform_6, window_bounds = array<i64: 2, 8, 1>}, {pipeline_mode = #tpu.pipeline_mode<synchronous>, transform_indices = @transform_7, window_bounds = array<i64: 80, 32>}, {pipeline_mode = #tpu.pipeline_mode<synchronous>, transform_indices = @transform_8, window_bounds = array<i64: 72, 4>}, {transform_indices = @transform_9, window_bounds = array<i64: 2, 4>}]} {
    %c0 = arith.constant 0 : index
    %c0_0 = arith.constant 0 : index
    %0 = vector.load %arg8[%c0, %c0_0] : memref<80x32xf32, #tpu.memory_space<vmem>>, vector<80x32xf32>
    %1 = vector.extract_strided_slice %0 {offsets = [0, 0], sizes = [24, 32], strides = [1, 1]} : vector<80x32xf32> to vector<24x32xf32>
    %2 = arith.truncf %1 : vector<24x32xf32> to vector<24x32xbf16>
    %3 = vector.extract_strided_slice %0 {offsets = [24, 0], sizes = [32, 32], strides = [1, 1]} : vector<80x32xf32> to vector<32x32xf32>
    %4 = arith.truncf %3 : vector<32x32xf32> to vector<32x32xbf16>
    %5 = vector.extract_strided_slice %0 {offsets = [56, 0], sizes = [16, 32], strides = [1, 1]} : vector<80x32xf32> to vector<16x32xf32>
    %6 = arith.truncf %5 : vector<16x32xf32> to vector<16x32xbf16>
    %7 = vector.extract_strided_slice %0 {offsets = [72, 0], sizes = [1, 32], strides = [1, 1]} : vector<80x32xf32> to vector<1x32xf32>
    %8 = vector.extract_strided_slice %0 {offsets = [73, 0], sizes = [1, 32], strides = [1, 1]} : vector<80x32xf32> to vector<1x32xf32>
    %9 = vector.extract_strided_slice %0 {offsets = [74, 0], sizes = [1, 32], strides = [1, 1]} : vector<80x32xf32> to vector<1x32xf32>
    %10 = vector.extract_strided_slice %0 {offsets = [75, 0], sizes = [1, 32], strides = [1, 1]} : vector<80x32xf32> to vector<1x32xf32>
    %c0_1 = arith.constant 0 : index
    %c0_2 = arith.constant 0 : index
    %11 = vector.load %arg9[%c0_1, %c0_2] : memref<72x4xf32, #tpu.memory_space<vmem>>, vector<72x4xf32>
    %12 = vector.extract_strided_slice %11 {offsets = [0, 0], sizes = [32, 4], strides = [1, 1]} : vector<72x4xf32> to vector<32x4xf32>
    %13 = arith.truncf %12 : vector<32x4xf32> to vector<32x4xbf16>
    %14 = vector.extract_strided_slice %11 {offsets = [32, 0], sizes = [32, 4], strides = [1, 1]} : vector<72x4xf32> to vector<32x4xf32>
    %15 = arith.truncf %14 : vector<32x4xf32> to vector<32x4xbf16>
    %16 = vector.extract_strided_slice %11 {offsets = [64, 0], sizes = [1, 4], strides = [1, 1]} : vector<72x4xf32> to vector<1x4xf32>
    %c0_3 = arith.constant 0 : index
    %c0_4 = arith.constant 0 : index
    %17 = vector.load %arg3[%c0_3, %c0_4] : memref<2x8xf32, #tpu.memory_space<vmem>>, vector<2x8xf32>
    %c0_5 = arith.constant 0 : index
    %c0_6 = arith.constant 0 : index
    %18 = vector.load %arg4[%c0_5, %c0_6] : memref<2x8xf32, #tpu.memory_space<vmem>>, vector<2x8xf32>
    %c0_7 = arith.constant 0 : index
    %c0_8 = arith.constant 0 : index
    %19 = vector.load %arg5[%c0_7, %c0_8] : memref<2x8xi32, #tpu.memory_space<vmem>>, vector<2x8xi32>
    %c0_9 = arith.constant 0 : index
    %c0_10 = arith.constant 0 : index
    %20 = vector.load %arg6[%c0_9, %c0_10] : memref<2x8xi32, #tpu.memory_space<vmem>>, vector<2x8xi32>
    %c0_11 = arith.constant 0 : index
    %c0_12 = arith.constant 0 : index
    %c0_13 = arith.constant 0 : index
    %21 = vector.load %arg7[%c0_11, %c0_12, %c0_13] : memref<2x8x1xf32, #tpu.memory_space<vmem>>, vector<2x8x1xf32>
    %cst = arith.constant dense<0.000000e+00> : vector<2xf32>
    %22 = vector.multi_reduction <add>, %17, %cst [1] : vector<2x8xf32> to vector<2xf32>
    %23 = vector.shape_cast %22 : vector<2xf32> to vector<2x1xf32>
    %cst_14 = arith.constant dense<0.000000e+00> : vector<2xf32>
    %24 = vector.multi_reduction <add>, %18, %cst_14 [1] : vector<2x8xf32> to vector<2xf32>
    %25 = vector.shape_cast %24 : vector<2xf32> to vector<2x1xf32>
    %cst_15 = arith.constant 1.000000e+00 : f32
    %26 = vector.broadcast %cst_15 : f32 to vector<2x1xf32>
    %27 = arith.maximumf %23, %26 : vector<2x1xf32>
    %28 = tpu.reciprocal %27 {approx = true} : vector<2x1xf32> -> vector<2x1xf32>
    %cst_16 = arith.constant 1.000000e+00 : f32
    %29 = vector.broadcast %cst_16 : f32 to vector<2x1xf32>
    %30 = arith.maximumf %25, %29 : vector<2x1xf32>
    %31 = tpu.reciprocal %30 {approx = true} : vector<2x1xf32> -> vector<2x1xf32>
    %32 = arith.mulf %23, %28 : vector<2x1xf32>
    %33 = arith.mulf %25, %31 : vector<2x1xf32>
    %c0_17 = arith.constant 0 : index
    %c0_18 = arith.constant 0 : index
    %c0_19 = arith.constant 0 : index
    %34 = vector.load %arg1[%c0_17, %c0_18, %c0_19] : memref<2x8x24xf32, #tpu.memory_space<vmem>>, vector<2x8x24xf32>
    %35 = vector.shape_cast %17 : vector<2x8xf32> to vector<2x8x1xf32>
    %36 = vector.broadcast %35 : vector<2x8x1xf32> to vector<2x8x24xf32>
    %37 = arith.mulf %34, %36 : vector<2x8x24xf32>
    %cst_20 = arith.constant dense<0.000000e+00> : vector<2x24xf32>
    %38 = vector.multi_reduction <add>, %37, %cst_20 [1] : vector<2x8x24xf32> to vector<2x24xf32>
    %39 = vector.broadcast %28 : vector<2x1xf32> to vector<2x24xf32>
    %40 = arith.mulf %38, %39 : vector<2x24xf32>
    %c0_21 = arith.constant 0 : index
    %c0_22 = arith.constant 0 : index
    %c0_23 = arith.constant 0 : index
    %41 = vector.load %arg2[%c0_21, %c0_22, %c0_23] : memref<2x8x32xf32, #tpu.memory_space<vmem>>, vector<2x8x32xf32>
    %42 = vector.shape_cast %18 : vector<2x8xf32> to vector<2x8x1xf32>
    %43 = vector.broadcast %42 : vector<2x8x1xf32> to vector<2x8x32xf32>
    %44 = arith.mulf %41, %43 : vector<2x8x32xf32>
    %cst_24 = arith.constant dense<0.000000e+00> : vector<2x32xf32>
    %45 = vector.multi_reduction <add>, %44, %cst_24 [1] : vector<2x8x32xf32> to vector<2x32xf32>
    %46 = vector.broadcast %31 : vector<2x1xf32> to vector<2x32xf32>
    %47 = arith.mulf %45, %46 : vector<2x32xf32>
    %48 = vector.shape_cast %18 : vector<2x8xf32> to vector<2x8x1xf32>
    %49 = arith.mulf %21, %48 : vector<2x8x1xf32>
    %cst_25 = arith.constant dense<0.000000e+00> : vector<2x1xf32>
    %50 = vector.multi_reduction <add>, %49, %cst_25 [1] : vector<2x8x1xf32> to vector<2x1xf32>
    %51 = arith.mulf %50, %31 : vector<2x1xf32>
    %52 = tpu.iota {dimensions = array<i32: 2>} : vector<2x8x16xi32>
    %53 = vector.shape_cast %19 : vector<2x8xi32> to vector<2x8x1xi32>
    %54 = vector.broadcast %53 : vector<2x8x1xi32> to vector<2x8x16xi32>
    %55 = arith.cmpi eq, %54, %52 : vector<2x8x16xi32>
    %56 = vector.shape_cast %17 : vector<2x8xf32> to vector<2x8x1xf32>
    %cst_26 = arith.constant 5.000000e-01 : f32
    %57 = vector.broadcast %cst_26 : f32 to vector<2x8x1xf32>
    %58 = arith.cmpf ogt, %56, %57 : vector<2x8x1xf32>
    %59 = vector.broadcast %58 : vector<2x8x1xi1> to vector<2x8x16xi1>
    %60 = arith.andi %55, %59 : vector<2x8x16xi1>
    %61 = arith.extui %60 : vector<2x8x16xi1> to vector<2x8x16xi32>
    %62 = arith.sitofp %61 : vector<2x8x16xi32> to vector<2x8x16xf32>
    %cst_27 = arith.constant dense<0.000000e+00> : vector<2x16xf32>
    %63 = vector.multi_reduction <add>, %62, %cst_27 [1] : vector<2x8x16xf32> to vector<2x16xf32>
    %64 = vector.broadcast %28 : vector<2x1xf32> to vector<2x16xf32>
    %65 = arith.mulf %63, %64 : vector<2x16xf32>
    %66 = tpu.iota {dimensions = array<i32: 2>} : vector<2x8x16xi32>
    %67 = vector.shape_cast %20 : vector<2x8xi32> to vector<2x8x1xi32>
    %68 = vector.broadcast %67 : vector<2x8x1xi32> to vector<2x8x16xi32>
    %69 = arith.cmpi eq, %68, %66 : vector<2x8x16xi32>
    %70 = vector.shape_cast %18 : vector<2x8xf32> to vector<2x8x1xf32>
    %cst_28 = arith.constant 5.000000e-01 : f32
    %71 = vector.broadcast %cst_28 : f32 to vector<2x8x1xf32>
    %72 = arith.cmpf ogt, %70, %71 : vector<2x8x1xf32>
    %73 = vector.broadcast %72 : vector<2x8x1xi1> to vector<2x8x16xi1>
    %74 = arith.andi %69, %73 : vector<2x8x16xi1>
    %75 = arith.extui %74 : vector<2x8x16xi1> to vector<2x8x16xi32>
    %76 = arith.sitofp %75 : vector<2x8x16xi32> to vector<2x8x16xf32>
    %cst_29 = arith.constant dense<0.000000e+00> : vector<2x16xf32>
    %77 = vector.multi_reduction <add>, %76, %cst_29 [1] : vector<2x8x16xf32> to vector<2x16xf32>
    %78 = vector.broadcast %31 : vector<2x1xf32> to vector<2x16xf32>
    %79 = arith.mulf %77, %78 : vector<2x16xf32>
    %80 = tpu.concatenate %65, %79 in 0 : vector<2x16xf32>, vector<2x16xf32> -> vector<4x16xf32>
    %81 = arith.truncf %80 : vector<4x16xf32> to vector<4x16xbf16>
    %cst_30 = arith.constant dense<0.000000e+00> : vector<4x32xf32>
    %82 = tpu.matmul %81, %6, %cst_30 {dimension_numbers = #tpu.dot_dimension_numbers<[1], [0], [0], [1], [0, 0, 1, 1], [], []>} : vector<4x16xbf16>, vector<16x32xbf16>, vector<4x32xf32> -> vector<4x32xf32>
    %83 = vector.extract_strided_slice %82 {offsets = [0, 0], sizes = [2, 32], strides = [1, 1]} : vector<4x32xf32> to vector<2x32xf32>
    %84 = vector.extract_strided_slice %82 {offsets = [2, 0], sizes = [2, 32], strides = [1, 1]} : vector<4x32xf32> to vector<2x32xf32>
    %85 = arith.truncf %40 : vector<2x24xf32> to vector<2x24xbf16>
    %cst_31 = arith.constant dense<0.000000e+00> : vector<2x32xf32>
    %86 = tpu.matmul %85, %2, %cst_31 {dimension_numbers = #tpu.dot_dimension_numbers<[1], [0], [0], [1], [0, 0, 1, 1], [], []>} : vector<2x24xbf16>, vector<24x32xbf16>, vector<2x32xf32> -> vector<2x32xf32>
    %87 = vector.broadcast %32 : vector<2x1xf32> to vector<2x32xf32>
    %88 = vector.broadcast %7 : vector<1x32xf32> to vector<2x32xf32>
    %89 = arith.mulf %87, %88 : vector<2x32xf32>
    %90 = arith.addf %86, %89 : vector<2x32xf32>
    %91 = arith.addf %90, %83 : vector<2x32xf32>
    %92 = arith.truncf %47 : vector<2x32xf32> to vector<2x32xbf16>
    %cst_32 = arith.constant dense<0.000000e+00> : vector<2x32xf32>
    %93 = tpu.matmul %92, %4, %cst_32 {dimension_numbers = #tpu.dot_dimension_numbers<[1], [0], [0], [1], [0, 0, 1, 1], [], []>} : vector<2x32xbf16>, vector<32x32xbf16>, vector<2x32xf32> -> vector<2x32xf32>
    %94 = arith.addf %8, %9 : vector<1x32xf32>
    %95 = vector.broadcast %33 : vector<2x1xf32> to vector<2x32xf32>
    %96 = vector.broadcast %94 : vector<1x32xf32> to vector<2x32xf32>
    %97 = arith.mulf %95, %96 : vector<2x32xf32>
    %98 = arith.addf %93, %97 : vector<2x32xf32>
    %99 = vector.broadcast %51 : vector<2x1xf32> to vector<2x32xf32>
    %100 = vector.broadcast %10 : vector<1x32xf32> to vector<2x32xf32>
    %101 = arith.mulf %99, %100 : vector<2x32xf32>
    %102 = arith.addf %98, %101 : vector<2x32xf32>
    %103 = arith.addf %102, %84 : vector<2x32xf32>
    %104 = arith.truncf %91 : vector<2x32xf32> to vector<2x32xbf16>
    %cst_33 = arith.constant dense<0.000000e+00> : vector<2x4xf32>
    %105 = tpu.matmul %104, %13, %cst_33 {dimension_numbers = #tpu.dot_dimension_numbers<[1], [0], [0], [1], [0, 0, 1, 1], [], []>} : vector<2x32xbf16>, vector<32x4xbf16>, vector<2x4xf32> -> vector<2x4xf32>
    %106 = arith.truncf %103 : vector<2x32xf32> to vector<2x32xbf16>
    %cst_34 = arith.constant dense<0.000000e+00> : vector<2x4xf32>
    %107 = tpu.matmul %106, %15, %cst_34 {dimension_numbers = #tpu.dot_dimension_numbers<[1], [0], [0], [1], [0, 0, 1, 1], [], []>} : vector<2x32xbf16>, vector<32x4xbf16>, vector<2x4xf32> -> vector<2x4xf32>
    %108 = arith.addf %105, %107 : vector<2x4xf32>
    %109 = vector.broadcast %16 : vector<1x4xf32> to vector<2x4xf32>
    %110 = arith.addf %108, %109 : vector<2x4xf32>
    %111 = math.tanh %110 : vector<2x4xf32>
    %c0_35 = arith.constant 0 : index
    %c0_36 = arith.constant 0 : index
    %112 = vector.load %arg10[%c0_35, %c0_36] : memref<2x4xf32, #tpu.memory_space<vmem>>, vector<2x4xf32>
    tpu.vector_store %arg10[%c0_35, %c0_36], %111 {strides = array<i32>} : memref<2x4xf32, #tpu.memory_space<vmem>>, vector<2x4xf32>,
    return
  }
  func.func @transform_0(%arg0: i32) -> (i32, i32, i32) {
    %c0_i32 = arith.constant 0 : i32
    %c0_i32_0 = arith.constant 0 : i32
    %c0_i32_1 = arith.constant 0 : i32
    return %arg0, %c0_i32, %c0_i32_0 : i32, i32, i32
  }
  func.func @transform_1(%arg0: i32) -> (i32, i32, i32) {
    %c0_i32 = arith.constant 0 : i32
    %c0_i32_0 = arith.constant 0 : i32
    %c0_i32_1 = arith.constant 0 : i32
    return %arg0, %c0_i32, %c0_i32_0 : i32, i32, i32
  }
  func.func @transform_2(%arg0: i32) -> (i32, i32) {
    %c0_i32 = arith.constant 0 : i32
    %c0_i32_0 = arith.constant 0 : i32
    return %arg0, %c0_i32 : i32, i32
  }
  func.func @transform_3(%arg0: i32) -> (i32, i32) {
    %c0_i32 = arith.constant 0 : i32
    %c0_i32_0 = arith.constant 0 : i32
    return %arg0, %c0_i32 : i32, i32
  }
  func.func @transform_4(%arg0: i32) -> (i32, i32) {
    %c0_i32 = arith.constant 0 : i32
    %c0_i32_0 = arith.constant 0 : i32
    return %arg0, %c0_i32 : i32, i32
  }
  func.func @transform_5(%arg0: i32) -> (i32, i32) {
    %c0_i32 = arith.constant 0 : i32
    %c0_i32_0 = arith.constant 0 : i32
    return %arg0, %c0_i32 : i32, i32
  }
  func.func @transform_6(%arg0: i32) -> (i32, i32, i32) {
    %c0_i32 = arith.constant 0 : i32
    %c0_i32_0 = arith.constant 0 : i32
    %c0_i32_1 = arith.constant 0 : i32
    return %arg0, %c0_i32, %c0_i32_0 : i32, i32, i32
  }
  func.func @transform_7(%arg0: i32) -> (i32, i32) {
    %c0_i32 = arith.constant 0 : i32
    %c0_i32_0 = arith.constant 0 : i32
    %c0_i32_1 = arith.constant 0 : i32
    return %c0_i32, %c0_i32_0 : i32, i32
  }
  func.func @transform_8(%arg0: i32) -> (i32, i32) {
    %c0_i32 = arith.constant 0 : i32
    %c0_i32_0 = arith.constant 0 : i32
    %c0_i32_1 = arith.constant 0 : i32
    return %c0_i32, %c0_i32_0 : i32, i32
  }
  func.func @transform_9(%arg0: i32) -> (i32, i32) {
    %c0_i32 = arith.constant 0 : i32
    %c0_i32_0 = arith.constant 0 : i32
    return %arg0, %c0_i32 : i32, i32
  }
}

</mosaic_0001>

<bundles_post_ra>
// kernel: translation_policy_forward.1
= control target key start
LH: loop header
LB: loop body
LE: loop exit
PB: predicated region body
PF: predicated region fallthrough
CT: control target
= control target key end

     0   :  { %vm68_vm0 = vcmask 58368   ;;  %v84_v1 = vlaneseq  ;;  %s678_s0 = inlined_call_operand.vmem [shape: f32[2,8,24], index: 0, kind: input, shape index: {}]   ;;  %s679_s1 = inlined_call_operand.vmem [shape: f32[2,8,32], index: 1, kind: input, shape index: {}]   ;;  %s680_s2 = inlined_call_operand.vmem [shape: f32[2,8], index: 2, kind: input, shape index: {}]   ;;  %s681_s3 = inlined_call_operand.vmem [shape: f32[2,8], index: 3, kind: input, shape index: {}]   ;;  %s682_s4 = inlined_call_operand.vmem [shape: s32[2,8], index: 4, kind: input, shape index: {}]   ;;  %s683_s5 = inlined_call_operand.vmem [shape: s32[2,8], index: 5, kind: input, shape index: {}]   ;;  %s684_s6 = inlined_call_operand.vmem [shape: f32[2,8,1], index: 6, kind: input, shape index: {}]   ;;  %s685_s7 = inlined_call_operand.vmem [shape: f32[80,32], index: 7, kind: input, shape index: {}]   ;;  %s686_s8 = inlined_call_operand.vmem [shape: f32[72,4], index: 8, kind: input, shape index: {}]   ;;  %s687_s9 = inlined_call_operand.hbm [shape: f32[2,4], index: 9, kind: output, shape index: {}]  }
   0x1   :  { %v63_v0 = vld [vmem:[%s681_s3] sm:$0x3] }
   0x2   :  { %v72_v2 = vsel %vm68_vm0, %v63_v0, 0.0  ;;  %v85_v3 = vshrl.u32 %v84_v1, 7 }
   0x3   :  { %73 = vadd.xlane.f32.xlu1 %v72_v2 }
   0x4   :  { %14 = vsyncpa [#allocation3], 0  ;;  %456 = vset.pattern.permute.xlu2 %v85_v3  ;;  %454 = vset.pattern.permute.xlu0 %v85_v3  ;;  %v64_v4 = vld [vmem:[%s682_s4] sm:$0x3]  ;;  %v129_v6 = vperm.slane %v63_v0, 1  ;;  %v122_v9 = vperm.slane %v63_v0, 0 }
   0x5   :  { %455 = vset.pattern.permute.xlu1 %v85_v3  ;;  %v187_v5 = vperm.slane %v64_v4, 1  ;;  %v65_v7 = vld [vmem:[%s683_s5] sm:$0x3]  ;;  %v180_v14 = vperm.slane %v64_v4, 0  ;;  %v39_v17 = vld [vmem:[%s685_s7 + $0x28] sm:$0xff]  ;;  %v40_v18 = vld [vmem:[%s685_s7 + $0x30] sm:$0xff] }
   0x6   :  { %v225_v8 = vperm.slane %v65_v7, 0  ;;  %v62_v10 = vld [vmem:[%s680_s2] sm:$0x3]  ;;  %v232_v12 = vperm.slane %v65_v7, 1  ;;  %v47_v20 = vpack.c.bf16 %v40_v18, %v39_v17  ;;  %v37_v21 = vld [vmem:[%s685_s7 + $0x18] sm:$0xff]  ;;  %v67_v24 = vld [vmem:[%s684_s6 + $0x8] sm:$0xff] }
   0x7   :  { %v90_v11 = vperm.slane %v62_v10, 1  ;;  %v83_v13 = vperm.slane %v62_v10, 0  ;;  %v69_v15 = vsel %vm68_vm0, %v62_v10, 0.0  ;;  %v38_v22 = vld [vmem:[%s685_s7 + $0x20] sm:$0xff]  ;;  %v121_v25 = vld [vmem:[%s679_s1 + $0x8] sm:$0xff]  ;;  %vm138_vm1 = vcmask 261120  }
   0x8   :  { %357 = vmatpush.bf16.msra.mxu2 %v47_v20  ;;  %v46_v23 = vpack.c.bf16 %v38_v22, %v37_v21  ;;  %vm161_vm2 = vcmask 7168   ;;  %v66_v37 = vld [vmem:[%s684_s6] sm:$0xff]  ;;  %v491_v39 = vmov 0   ;;  %vm272_vm3 = vcmask 1041409   ;;  %s493_s11 = smov [#allocation2]   ;;  %s433_s14 = sshll.u32 %s687_s9, 4  ;;  %s434_s14 = int_to_ptr.hbm [resolvable:$true] %s433_s14 }
   0x9   :  { %v120_v38 = vld [vmem:[%s679_s1] sm:$0xff]  ;;  %v492_v21 = vmov 0.0   ;;  %vm315_vm12 = vcmask 1043456   ;;  %vm208_vm13 = vcmask 130048   ;;  %s431_s12 = sshll.u32 %s493_s11, 4  ;;  %s432_s12 = int_to_ptr.vmem [resolvable:$true] %s431_s12 }
   0xc   :  { %192 = vperm.xlu2 %456, %v187_v5   ;;  %134 = vperm.xlu0 %454, %v129_v6  }
   0xd   :  { %358 = vmatpush.bf16.msra.mxu2 %v46_v23  ;;  %v36_v23 = vld [vmem:[%s685_s7 + $0x10] sm:$0xff] }
  0x14   :  { %230 = vperm.xlu2 %456, %v225_v8   ;;  %127 = vperm.xlu0 %454, %v122_v9  }
  0x1c   :  { %95 = vperm.xlu1 %455, %v90_v11   ;;  %237 = vperm.xlu0 %454, %v232_v12  }
  0x1d   :  { %88 = vperm.xlu2 %456, %v83_v13  }
  0x24   :  { %185 = vperm.xlu0 %454, %v180_v14   ;;  %458 = vset.pattern.permute.xlu1 %v491_v39  ;;  %v179_v14 = vand.u32 127, %v84_v1 }
  0x2c   :  { %457 = vset.pattern.permute.xlu0 %v491_v39 }
  0x46   :  { %70 = vadd.xlane.f32.xlu2 %v69_v15 }
  0x66   :  { %v193_v58 = vpop.permute.xlu2 %192 }
  0x67   :  { %vm195_vm11 = vcmp.eq.s32.totalorder %v193_v58, %v179_v14 }
  0x6e   :  { %v231_v11 = vpop.permute.xlu2 %230 }
  0x6f   :  { %vm239_vm7 = vcmp.eq.s32.totalorder %v231_v11, %v179_v14 }
  0x76   :  { %v74_v16 = vpop.xlane.xlu1 %73 }
  0x77   :  { %v77_v19 = vmax.f32 %v74_v16, 1.0  ;;  %v89_v20 = vpop.permute.xlu2 %88 }
  0x78   :  { %vm196_vm0 = vcmp.gt.f32.partialorder %v89_v20, 0.5 }
  0x79   :  { %459 = vrcp.f32 %v77_v19  ;;  %v81_v19 = vld [vmem:[%s678_s0] sm:$0xff] }
  0x7e   :  { %v579_v27 = vpop.permute.xlu0 %134 }
  0x7f   :  { %v577_v26 = vpop.eup %459  ;;  %v137_v28 = vmul.f32 %v579_v27, %v121_v25  ;;  %v160_v29 = vmul.f32 %v579_v27, %v67_v24  ;;  %vm242_vm4 = vcmp.gt.f32.partialorder %v579_v27, 0.5  ;;  %v41_v24 = vld [vmem:[%s685_s7 + $0x38] sm:$0xff]  ;;  %v42_v25 = vld [vmem:[%s685_s7 + $0x40] sm:$0xff] }
  0x80   :  { %v584_v30 = vmul.f32 %v577_v26, %v74_v16  ;;  %v597_v52 = vrot.slane %v577_v26, 1 }
  0x81   :  { %v146_v31 = vsel %vm138_vm1, %v137_v28, 0.0  ;;  %v169_v32 = vsel %vm161_vm2, %v160_v29, 0.0  ;;  %v45_v28 = vpack.c.bf16 %v36_v23, %v36_v23  ;;  %v48_v29 = vpack.c.bf16 %v42_v25, %v41_v24 }
  0x82   :  { %v147_v33 = vrot.slane %v146_v31, 4  ;;  %v170_v34 = vrot.slane %v169_v32, 4 }
  0x83   :  { %295 = vmatpush.bf16.msra.mxu0 %v48_v29 }
  0x84   :  { %v148_v35 = vadd.f32 %v147_v33, %v146_v31  ;;  %v171_v36 = vadd.f32 %v170_v34, %v169_v32  ;;  %v82_v31 = vld [vmem:[%s678_s0 + $0x8] sm:$0xff]  ;;  %v97_v32 = vmul.f32 %v89_v20, %v81_v19  ;;  %v317_v34 = vsel %vm315_vm12, %v45_v28, 0 }
  0x85   :  { %325 = vmatpush.bf16.msra.mxu1 %v317_v34 }
  0x86   :  { %v149_v40 = vrot.slane %v148_v35, 2  ;;  %v172_v41 = vrot.slane %v171_v36, 2  ;;  %v128_v42 = vpop.permute.xlu0 %127 }
  0x87   :  { %v136_v43 = vmul.f32 %v128_v42, %v120_v38  ;;  %v159_v44 = vmul.f32 %v128_v42, %v66_v37  ;;  %vm241_vm6 = vcmp.gt.f32.partialorder %v128_v42, 0.5 }
  0x88   :  { %v150_v45 = vadd.f32 %v149_v40, %v148_v35  ;;  %v173_v46 = vadd.f32 %v172_v41, %v171_v36  ;;  %vm247_vm9 = vmand %vm239_vm7, %vm241_vm6  ;;  %v34_v40 = vld [vmem:[%s685_s7] sm:$0xff]  ;;  %v35_v41 = vld [vmem:[%s685_s7 + $0x8] sm:$0xff]  ;;  %vm282_vm6 = vcmask 1041408  }
  0x89   :  { %v139_v47 = vsel %vm138_vm1, %v136_v43, 0.0  ;;  %v162_v48 = vsel %vm161_vm2, %v159_v44, 0.0  ;;  %v444_v27 = vsel %vm247_vm9, 1.0, %v492_v21  ;;  %vm99_vm2 = vcmask 195584  }
  0x8a   :  { %v151_v49 = vrot.slane %v150_v45, 1  ;;  %v140_v50 = vrot.slane %v139_v47, 4  ;;  %v163_v51 = vrot.slane %v162_v48, 4  ;;  %v174_v53 = vrot.slane %v173_v46, 1 }
  0x8b   :  { %v253_v35 = vsel %vm208_vm13, %v444_v27, 0.0  ;;  %v100_v42 = vsel %vm99_vm2, %v97_v32, 0.0 }
  0x8c   :  { %v152_v54 = vadd.f32 %v151_v49, %v150_v45  ;;  %v141_v55 = vadd.f32 %v140_v50, %v139_v47  ;;  %v164_v56 = vadd.f32 %v163_v51, %v162_v48  ;;  %v175_v57 = vadd.f32 %v174_v53, %v173_v46 }
  0x8d   :  { %v254_v39 = vrot.slane %v253_v35, 4  ;;  %v44_v45 = vpack.c.bf16 %v35_v41, %v34_v40  ;;  %v101_v48 = vrot.slane %v100_v42, 4 }
  0x8e   :  { %v142_v59 = vrot.slane %v141_v55, 2  ;;  %v165_v60 = vrot.slane %v164_v56, 2  ;;  %v158_v61 = vmul.f32 %v597_v52, %v152_v54  ;;  %v177_v62 = vmul.f32 %v175_v57, %v597_v52  ;;  %v238_v10 = vpop.permute.xlu0 %237  ;;  %v96_v18 = vpop.permute.xlu1 %95 }
  0x8f   :  { %vm240_vm5 = vcmp.eq.s32.totalorder %v238_v10, %v179_v14  ;;  %vm197_vm10 = vcmp.gt.f32.partialorder %v96_v18, 0.5  ;;  %v98_v36 = vmul.f32 %v96_v18, %v82_v31  ;;  %326 = vmatpush.bf16.msra.mxu1 %v44_v45  ;;  %v255_v51 = vadd.f32 %v254_v39, %v253_v35  ;;  %v52_v45 = vld [vmem:[%s686_s8 + $0x18] sm:$0xff] }
  0x90   :  { %v143_v63 = vadd.f32 %v142_v59, %v141_v55  ;;  %v166_v0 = vadd.f32 %v165_v60, %v164_v56  ;;  %v334_v2 = vpack.c.bf16 %v158_v61, %v158_v61  ;;  %371 = vperm.xlu0 %457, %v177_v62   ;;  %vm248_vm8 = vmand %vm240_vm5, %vm242_vm4  ;;  %v102_v56 = vadd.f32 %v101_v48, %v100_v42  ;;  %v55_v48 = vld [vmem:[%s686_s8 + $0x30] sm:$0xff] }
  0x91   :  { %v445_v22 = vsel %vm248_vm8, 1.0, %v492_v21  ;;  %vm203_vm14 = vmand %vm195_vm11, %vm197_vm10  ;;  %v107_v46 = vsel %vm99_vm2, %v98_v36, 0.0  ;;  %v256_v58 = vrot.slane %v255_v51, 2  ;;  %vm279_vm5 = vcmask 1043459  }
  0x92   :  { %v144_v3 = vrot.slane %v143_v63, 1  ;;  %v167_v4 = vrot.slane %v166_v0, 1  ;;  %v344_v6 = vunpack.c.l.b16 %v334_v2  ;;  %v260_v33 = vsel %vm208_vm13, %v445_v22, 0.0 }
  0x93   :  { %v443_v37 = vsel %vm203_vm14, 1.0, %v492_v21  ;;  %v261_v38 = vrot.slane %v260_v33, 4  ;;  %v108_v53 = vrot.slane %v107_v46, 4  ;;  %v103_v62 = vrot.slane %v102_v56, 2 }
  0x94   :  { %v145_v5 = vadd.f32 %v144_v3, %v143_v63  ;;  %v168_v7 = vadd.f32 %v167_v4, %v166_v0  ;;  %v345_v13 = vrot.slane %v344_v6, 7  ;;  %v216_v43 = vsel %vm208_vm13, %v443_v37, 0.0 }
  0x95   :  { %v262_v47 = vadd.f32 %v261_v38, %v260_v33  ;;  %v217_v49 = vrot.slane %v216_v43, 4  ;;  %v109_v59 = vadd.f32 %v108_v53, %v107_v46  ;;  %v257_v0 = vadd.f32 %v256_v58, %v255_v51  ;;  %v53_v53 = vld [vmem:[%s686_s8 + $0x20] sm:$0xff] }
  0x96   :  { %v157_v8 = vmul.f32 %v577_v26, %v145_v5  ;;  %v176_v9 = vmul.f32 %v577_v26, %v168_v7  ;;  %v186_v1 = vpop.permute.xlu0 %185  ;;  %v104_v6 = vadd.f32 %v103_v62, %v102_v56  ;;  %v49_v56 = vld [vmem:[%s686_s8] sm:$0xff] }
  0x97   :  { %vm194_vm15 = vcmp.eq.s32.totalorder %v186_v1, %v179_v14  ;;  %v263_v54 = vrot.slane %v262_v47, 2  ;;  %v218_v57 = vadd.f32 %v217_v49, %v216_v43  ;;  %v110_v2 = vrot.slane %v109_v59, 2  ;;  %v56_v49 = vld [vmem:[%s686_s8 + $0x38] sm:$0xff] }
  0x98   :  { %v333_v12 = vpack.c.bf16 %v157_v8, %v157_v8  ;;  %366 = vperm.xlu1 %458, %v176_v9   ;;  %vm202_vm4 = vmand %vm194_vm15, %vm196_vm0  ;;  %v258_v9 = vrot.slane %v257_v0, 1 }
  0x99   :  { %v442_v44 = vsel %vm202_vm4, 1.0, %v492_v21  ;;  %v264_v60 = vadd.f32 %v263_v54, %v262_v47  ;;  %v219_v63 = vrot.slane %v218_v57, 2  ;;  %v111_v10 = vadd.f32 %v110_v2, %v109_v59  ;;  %v54_v54 = vld [vmem:[%s686_s8 + $0x28] sm:$0xff] }
  0x9a   :  { %v343_v15 = vunpack.c.l.b16 %v333_v12  ;;  %v209_v50 = vsel %vm208_vm13, %v442_v44, 0.0  ;;  %v51_v44 = vld [vmem:[%s686_s8 + $0x10] sm:$0xff]  ;;  %v43_v59 = vld [vmem:[%s685_s7 + $0x48] sm:$0xff] }
  0x9b   :  { %v210_v55 = vrot.slane %v209_v50, 4  ;;  %v265_v3 = vrot.slane %v264_v60, 1  ;;  %v220_v7 = vadd.f32 %v219_v63, %v218_v57  ;;  %v59_v46 = vpack.c.bf16 %v52_v45, %v51_v44  ;;  %v50_v57 = vld [vmem:[%s686_s8 + $0x8] sm:$0xff] }
  0x9c   :  { %v346_v16 = vsel %vm272_vm3, %v345_v13, %v343_v15  ;;  %v105_v13 = vrot.slane %v104_v6, 1  ;;  %v259_v15 = vadd.f32 %v258_v9, %v257_v0  ;;  %v58_v58 = vpack.c.bf16 %v50_v57, %v49_v56 }
  0x9d   :  { %v347_v17 = vpack.c.b16 %v346_v16, %v346_v16  ;;  %v211_v61 = vadd.f32 %v210_v55, %v209_v50  ;;  %v266_v11 = vadd.f32 %v265_v3, %v264_v60  ;;  %v221_v14 = vrot.slane %v220_v7, 1  ;;  %414 = vmatpush.bf16.msrb.mxu0 %v59_v46 }
  0x9e   :  { %v112_v16 = vrot.slane %v111_v10, 1  ;;  %v106_v19 = vadd.f32 %v105_v13, %v104_v6  ;;  %v267_v21 = vmul.f32 %v577_v26, %v259_v15  ;;  %v61_v50 = vpack.c.bf16 %v56_v49, %v55_v48 }
  0x9f   :  { %448 = vmatmul.msk.bf16.vlgmr.msra.gmra.mxu2 %vm138_vm1, %v347_v17  ;;  %v212_v4 = vrot.slane %v211_v61, 2  ;;  %v268_v17 = vmul.f32 %v266_v11, %v597_v52  ;;  %v222_v20 = vadd.f32 %v221_v14, %v220_v7  ;;  %v60_v55 = vpack.c.bf16 %v54_v54, %v53_v53 }
  0xa0   :  { %v113_v24 = vadd.f32 %v112_v16, %v111_v10  ;;  %v277_v32 = vrot.slane %v267_v21, 6  ;;  %398 = vmatpush.bf16.msra.mxu3 %v61_v50  ;;  %v336_v60 = vrot.slane %v43_v59, 1  ;;  %v374_v62 = vperm.slane %v43_v59, 3 }
  0xa1   :  { %v213_v12 = vadd.f32 %v212_v4, %v211_v61  ;;  %v278_v29 = vrot.slane %v268_v17, 5  ;;  %415 = vmatpush.bf16.msrb.mxu0 %v58_v58 }
  0xa2   :  { %v338_v61 = vadd.f32 %v336_v60, %v43_v59 }
  0xa3   :  { %v214_v18 = vrot.slane %v213_v12, 1  ;;  %v280_v37 = vsel %vm279_vm5, %v278_v29, %v277_v32 }
  0xa4   :  { %399 = vmatpush.bf16.msra.mxu3 %v60_v55  ;;  %v339_v0 = vperm.slane %v338_v61, 1 }
  0xa5   :  { %v215_v27 = vadd.f32 %v214_v18, %v213_v12 }
  0xa6   :  { %v340_v4 = vmul.f32 %v339_v0, %v584_v30 }
  0xb9   :  { %v71_v5 = vpop.xlane.xlu2 %70 }
  0xba   :  { %v75_v8 = vmax.f32 %v71_v5, 1.0 }
  0xbc   :  { %461 = vrcp.f32 %v75_v8  ;;  %v303_v8 = vperm.slane %v43_v59, 0 }
  0xc2   :  { %v462_v1 = vpop.eup %461 }
  0xc3   :  { %v79_v22 = vmul.f32 %v462_v1, %v71_v5  ;;  %v115_v23 = vrot.slane %v462_v1, 1  ;;  %v118_v25 = vmul.f32 %v462_v1, %v106_v19  ;;  %v223_v33 = vmul.f32 %v462_v1, %v215_v27 }
  0xc5   :  { %v224_v28 = vmul.f32 %v222_v20, %v115_v23  ;;  %v119_v31 = vmul.f32 %v115_v23, %v113_v24  ;;  %v301_v52 = vpack.c.bf16 %v118_v25, %v118_v25  ;;  %v304_v13 = vmul.f32 %v303_v8, %v79_v22  ;;  %v57_v20 = vld [vmem:[%s686_s8 + $0x40] sm:$0xff] }
  0xc6   :  { %v421_v23 = vperm.slane %v57_v20, 0 }
  0xc7   :  { %v271_v34 = vrot.slane %v224_v28, 7  ;;  %v302_v35 = vpack.c.bf16 %v119_v31, %v119_v31  ;;  %v307_v40 = vunpack.c.l.b16 %v301_v52 }
  0xc9   :  { %v273_v36 = vsel %vm272_vm3, %v271_v34, %v223_v33  ;;  %v308_v38 = vunpack.c.l.b16 %v302_v35 }
  0xca   :  { %v283_v26 = vsel %vm282_vm6, %v273_v36, %v280_v37 }
  0xcb   :  { %v284_v39 = vpack.c.bf16 %v283_v26, %v283_v26  ;;  %v309_v41 = vrot.slane %v308_v38, 7 }
  0xcd   :  { %446 = vmatmul.msk.bf16.vlgmr.msra.gmra.mxu0 %vm208_vm13, %v284_v39  ;;  %v310_v42 = vsel %vm272_vm3, %v309_v41, %v307_v40 }
  0xce   :  { %v311_v43 = vpack.c.b16 %v310_v42, %v310_v42 }
  0xd0   :  { %447 = vmatmul.msk.bf16.vlgmr.msra.gmra.mxu1 %vm99_vm2, %v311_v43 }
 0x102   :  { %v372_v63 = vpop.permute.xlu0 %371 }
 0x103   :  { %v376_v2 = vmul.f32 %v374_v62, %v372_v63 }
 0x105   :  { %v379_v5 = vrot.slane %v376_v2, 7 }
 0x10a   :  { %v367_v3 = vpop.permute.xlu1 %366 }
 0x10b   :  { %v375_v6 = vmul.f32 %v374_v62, %v367_v3 }
 0x10d   :  { %v380_v9 = vsel %vm272_vm3, %v379_v5, %v375_v6 }
 0x122   :  { %v360_v47 = vpop.f32.mrf.mxu2 }
 0x123   :  { %v361_v7 = vadd.f32 %v360_v47, %v340_v4 }
 0x125   :  { %v382_v11 = vadd.f32 %v380_v9, %v361_v7 }
 0x12a   :  { %v362_v51 = vpop.f32.mrf.mxu2 }
 0x14a   :  { %v297_v10 = vpop.f32.mrf.mxu0 }
 0x14b   :  { %v384_v12 = vrot.slane %v297_v10, 2 }
 0x14d   :  { %v386_v14 = vadd.f32 %v384_v12, %v382_v11  ;;  %v328_v15 = vpop.f32.mrf.mxu1 }
 0x14e   :  { %v329_v16 = vadd.f32 %v328_v15, %v304_v13 }
 0x14f   :  { %v388_v17 = vpack.c.bf16 %v386_v14, %v386_v14 }
 0x150   :  { %v332_v18 = vadd.f32 %v329_v16, %v297_v10 }
 0x151   :  { %449 = vmatmul.msk.bf16.vlgmr.msra.gmra.mxu3 %vm138_vm1, %v388_v17 }
 0x152   :  { %v387_v19 = vpack.c.bf16 %v332_v18, %v332_v18  ;;  %v299_v1 = vpop.f32.mrf.mxu0 }
 0x154   :  { %450 = vmatmul.msk.bf16.vlgmr.msrb.gmra.mxu0 %vm138_vm1, %v387_v19  ;;  %vm424_vm1 = vcmask 25600  }
 0x155   :  { %v330_v30 = vpop.f32.mrf.mxu1 }
 0x1d1   :  { %v417_v21 = vpop.f32.mrf.mxu0 }
 0x1d4   :  { %v401_v24 = vpop.f32.mrf.mxu3 }
 0x1d5   :  { %v418_v22 = vadd.f32 %v417_v21, %v401_v24 }
 0x1d7   :  { %v422_v25 = vadd.f32 %v421_v23, %v418_v22 }
 0x1d9   :  { %463 = vtanh.f32 %v422_v25  ;;  %v419_v27 = vpop.f32.mrf.mxu0 }
 0x1dc   :  { %v403_v28 = vpop.f32.mrf.mxu3 }
 0x1df   :  { %v464_v29 = vpop.eup %463 }
 0x1e0   :  { %425 = vst.msk [vmem:[#allocation2] sm:$0x3] %vm424_vm1, %v464_v29 }
 0x1e1   :  { %436 = dma.vmem_to_hbm [thread:$0]  %s432_s12, 32, %s434_s14, [#allocation3]  }
 0x1e2   :  { %489 = dma.done.wait [#allocation3], 32  }
 0x1e3   :  { %490 = vsyncadd [#allocation3], 4294967264 }
 0x1e4   :  { %441 = vsyncpa [#allocation3], 1 }

</bundles_post_ra>
